<compile_context>
chip_gen: v7x
topology: tpu7x:2x2x1
jax: 0.10.0
libtpu: 0.0.40
codegen_flags: <defaults>
</compile_context>

<pallas_src>
import functools

import jax
import jax.numpy as jnp
from jax.experimental import pallas as pl
from jax.experimental.pallas import tpu as pltpu


# ----------------------------------------------------------------------------
# Kernel
# ----------------------------------------------------------------------------
def qnetwork_kernel(x_ref,
                    w1_ref, w2_ref, w3_ref, w4_ref,
                    b_ref, a_ref,
                    out_ref):
    hidden_dim = w1_ref.shape[1]
    output_dim = w4_ref.shape[1]
    w_dtype = w1_ref.dtype  # bf16 (default) or f32

    # Biases: one packed (4, maxd) f32 VMEM table; static per-layer slices.
    b_all = b_ref[...]
    b1 = b_all[0:1, :hidden_dim]
    b2 = b_all[1:2, :hidden_dim]
    b3 = b_all[2:3, :hidden_dim]
    b4 = b_all[3:4, :output_dim]

    # PReLU alphas live in SMEM: scalar-path reads, no vector loads needed.
    a1 = a_ref[0]
    a2 = a_ref[1]
    a3 = a_ref[2]

    def prelu(h, alpha):
        # f32 elementwise (VPU); matches PyTorch PReLU with scalar alpha.
        return jnp.where(h > 0, h, alpha * h)

    # Matmul inputs in the weight dtype (bf16 -> ~2-3x MXU throughput),
    # accumulation and all elementwise work in f32.
    x = x_ref[...].astype(w_dtype)

    h = jnp.dot(x, w1_ref[...], preferred_element_type=jnp.float32) + b1
    h = prelu(h, a1)

    h = jnp.dot(h.astype(w_dtype), w2_ref[...],
                preferred_element_type=jnp.float32) + b2
    h = prelu(h, a2)

    h = jnp.dot(h.astype(w_dtype), w3_ref[...],
                preferred_element_type=jnp.float32) + b3
    h = prelu(h, a3)

    q = jnp.dot(h.astype(w_dtype), w4_ref[...],
                preferred_element_type=jnp.float32) + b4
    out_ref[...] = q.astype(out_ref.dtype)


# ----------------------------------------------------------------------------
# Hardware / sizing helpers (generation-aware, with safe fallbacks)
# ----------------------------------------------------------------------------
@functools.lru_cache(maxsize=None)
def _vmem_capacity_bytes():
    try:
        return int(pltpu.get_tpu_info().vmem_capacity_bytes)
    except Exception:
        return 64 * 1024 * 1024  # conservative: v7x per-TC physical VMEM


@functools.lru_cache(maxsize=None)
def _num_tensorcores():
    # v7x has 2 TensorCores per chip; v5e/v6e have 1.
    try:
        kind = jax.devices()[0].device_kind.lower()
    except Exception:
        return 1
    return 2 if "v7" in kind else 1


def _derive_tm_max(input_dim, hidden_dim, output_dim, weight_bytes, vmem_budget):
    """Largest batch tile that keeps resident weights + double-buffered x/out
    tiles + ~3 live f32 (tm, hidden) intermediates inside ~70% of VMEM."""
    maxd = max(hidden_dim, output_dim)
    resident = weight_bytes * (input_dim * hidden_dim
                               + 2 * hidden_dim * hidden_dim
                               + hidden_dim * output_dim) + 4 * 4 * maxd
    per_row = 4 * (2 * input_dim + 2 * output_dim + 3 * hidden_dim)
    usable = int(vmem_budget * 0.7) - resident
    tm = (usable // max(per_row, 1)) // 8 * 8
    return int(max(256, min(2048, tm)))


# ----------------------------------------------------------------------------
# Forward wrapper
# ----------------------------------------------------------------------------
_BUFFERED_WEIGHTS_OK = True  # flipped off once if pipeline_mode=Buffered(1) is rejected


def qnetwork_forward(x, prepared, *, tm_max=None):
    """x: (n, input_dim) float32. prepared: output of prepare_params()."""
    global _BUFFERED_WEIGHTS_OK

    n, input_dim = x.shape
    hidden_dim = prepared["w1"].shape[1]
    output_dim = prepared["w4"].shape[1]
    maxd = prepared["b_all"].shape[1]
    weight_bytes = jnp.dtype(prepared["w1"].dtype).itemsize

    vmem_budget = _vmem_capacity_bytes()
    num_tc = _num_tensorcores()
    if tm_max is None:
        tm_max = _derive_tm_max(input_dim, hidden_dim, output_dim,
                                weight_bytes, vmem_budget)

    # ---- balanced batch tiling --------------------------------------------
    num_tiles = pl.cdiv(n, tm_max)
    if num_tc > 1 and n >= 1024:
        # Force an even number of tiles so both v7x TensorCores get work.
        num_tiles = num_tc * pl.cdiv(num_tiles, num_tc)
    tm = 8 * pl.cdiv(pl.cdiv(n, num_tiles), 8)   # multiple of 8 sublanes
    n_pad = tm * num_tiles                       # pads < 8 rows per tile
    x_p = jnp.pad(x, ((0, n_pad - n), (0, 0))) if n_pad != n else x

    # ---- cost estimate (helps XLA overlap this small call) -----------------
    flops = 2 * n_pad * (input_dim * hidden_dim
                         + 2 * hidden_dim * hidden_dim
                         + hidden_dim * output_dim)
    bytes_accessed = (4 * n_pad * (input_dim + output_dim)
                      + weight_bytes * (input_dim * hidden_dim
                                        + 2 * hidden_dim * hidden_dim
                                        + hidden_dim * output_dim)
                      + 4 * (4 * maxd + 3))
    cost = pl.CostEstimate(flops=int(flops), transcendentals=0,
                           bytes_accessed=int(bytes_accessed))

    # Explicit scoped-VMEM limit with headroom (v5e default is only 16 MiB).
    vmem_limit = int(min(vmem_budget, 128 * 1024 * 1024) * 0.75)

    def build(use_buffered):
        # Loop-invariant operands (weights, packed bias) never re-DMA across
        # the batch grid -> single-buffer them to halve their resident VMEM.
        wb = {"pipeline_mode": pl.Buffered(1)} if use_buffered else {}
        grid_spec = pltpu.PrefetchScalarGridSpec(
            num_scalar_prefetch=0,
            grid=(num_tiles,),
            in_specs=[
                # x: tiled along the batch axis, double-buffered pipeline.
                pl.BlockSpec((tm, input_dim), lambda i: (i, 0)),
                # weights: constant block index -> stay resident in VMEM.
                pl.BlockSpec((input_dim, hidden_dim), lambda i: (0, 0), **wb),
                pl.BlockSpec((hidden_dim, hidden_dim), lambda i: (0, 0), **wb),
                pl.BlockSpec((hidden_dim, hidden_dim), lambda i: (0, 0), **wb),
                pl.BlockSpec((hidden_dim, output_dim), lambda i: (0, 0), **wb),
                # packed bias table: loop-invariant.
                pl.BlockSpec((4, maxd), lambda i: (0, 0), **wb),
                # PReLU alphas on the scalar path (SMEM).
                pl.BlockSpec(memory_space=pltpu.MemorySpace.SMEM),
            ],
            out_specs=pl.BlockSpec((tm, output_dim), lambda i: (i, 0)),
        )
        return pl.pallas_call(
            qnetwork_kernel,
            out_shape=jax.ShapeDtypeStruct((n_pad, output_dim), jnp.float32),
            grid_spec=grid_spec,
            compiler_params=pltpu.CompilerParams(
                dimension_semantics=("parallel",),  # shard batch tiles across TCs
                vmem_limit_bytes=vmem_limit,
            ),
            cost_estimate=cost,
        )

    args = (x_p, prepared["w1"], prepared["w2"], prepared["w3"], prepared["w4"],
            prepared["b_all"], prepared["alphas"])

    if _BUFFERED_WEIGHTS_OK:
        try:
            out = build(True)(*args)
        except Exception:
            # Older Pallas without pipeline_mode=Buffered support: fall back
            # once to default double-buffering (correctness unaffected).
            _BUFFERED_WEIGHTS_OK = False
            out = build(False)(*args)
    else:
        out = build(False)(*args)

    return out[:n] if n_pad != n else out


# ----------------------------------------------------------------------------
# Parameters
# ----------------------------------------------------------------------------
def init_params(key, input_dim, hidden_dim, output_dim):
    """PyTorch-style init (uniform +/- 1/sqrt(fan_in)); PReLU alpha=0.25 per layer."""
    ks = jax.random.split(key, 8)

    def linear(kw, kb, fan_in, fan_out):
        bound = 1.0 / jnp.sqrt(fan_in)
        # stored transposed: (fan_in, fan_out)
        w = jax.random.uniform(kw, (fan_in, fan_out), jnp.float32, -bound, bound)
        b = jax.random.uniform(kb, (fan_out,), jnp.float32, -bound, bound)
        return w, b

    w1, b1 = linear(ks[0], ks[1], input_dim, hidden_dim)
    w2, b2 = linear(ks[2], ks[3], hidden_dim, hidden_dim)
    w3, b3 = linear(ks[4], ks[5], hidden_dim, hidden_dim)
    w4, b4 = linear(ks[6], ks[7], hidden_dim, output_dim)

    return {
        "w1": w1, "b1": b1, "a1": jnp.array(0.25, jnp.float32),
        "w2": w2, "b2": b2, "a2": jnp.array(0.25, jnp.float32),
        "w3": w3, "b3": b3, "a3": jnp.array(0.25, jnp.float32),
        "w4": w4, "b4": b4,
    }


def prepare_params(params, weight_dtype=jnp.bfloat16):
    """One-time packing + dtype cast (call at parameter-load time, NOT per step):
    packs the four biases into a single (4, maxd) f32 table, the three PReLU
    alphas into a (3,) f32 vector for SMEM, and casts weights to weight_dtype
    (bf16 default; pass jnp.float32 for an exact path)."""
    hidden_dim = params["w1"].shape[1]
    output_dim = params["w4"].shape[1]
    maxd = max(hidden_dim, output_dim)

    def pad_bias(b):
        b = b.reshape(1, -1).astype(jnp.float32)
        return jnp.pad(b, ((0, 0), (0, maxd - b.shape[-1])))

    b_all = jnp.concatenate(
        [pad_bias(params["b1"]), pad_bias(params["b2"]),
         pad_bias(params["b3"]), pad_bias(params["b4"])], axis=0)  # (4, maxd)

    alphas = jnp.stack([params["a1"].reshape(()),
                        params["a2"].reshape(()),
                        params["a3"].reshape(())]).astype(jnp.float32)  # (3,)

    wd = jnp.dtype(weight_dtype)
    return {
        "w1": params["w1"].astype(wd),
        "w2": params["w2"].astype(wd),
        "w3": params["w3"].astype(wd),
        "w4": params["w4"].astype(wd),
        "b_all": b_all,
        "alphas": alphas,
    }


def reference_forward(x, p):
    """Pure-JAX f32 reference for correctness check."""
    def prelu(h, a):
        return jnp.where(h > 0, h, a * h)
    h = prelu(x @ p["w1"] + p["b1"], p["a1"])
    h = prelu(h @ p["w2"] + p["b2"], p["a2"])
    h = prelu(h @ p["w3"] + p["b3"], p["a3"])
    return h @ p["w4"] + p["b4"]


# ----------------------------------------------------------------------------
# Self-test
# ----------------------------------------------------------------------------
if __name__ == "__main__":
    key = jax.random.PRNGKey(0)
    k_x, k_p = jax.random.split(key)

    n, input_dim, hidden_dim, output_dim = 8, 16, 32, 4
    x = jax.random.normal(k_x, (n, input_dim), jnp.float32)
    params = init_params(k_p, input_dim, hidden_dim, output_dim)
    q_ref = reference_forward(x, params)

    # Exact path: f32 weights, tight tolerance.
    prep_f32 = prepare_params(params, weight_dtype=jnp.float32)
    q = jax.block_until_ready(qnetwork_forward(x, prep_f32))
    assert q.shape == (n, output_dim)
    assert jnp.allclose(q, q_ref, atol=1e-4, rtol=1e-4), "f32 mismatch vs reference"

    # Default path: bf16 weights, f32 accumulation -> relaxed tolerance.
    prep_bf16 = prepare_params(params)
    q_bf = jax.block_until_ready(qnetwork_forward(x, prep_bf16))
    assert q_bf.shape == (n, output_dim)
    assert jnp.allclose(q_bf, q_ref, atol=1e-1, rtol=1e-1), "bf16 mismatch vs reference"

    # Batch that is not a multiple of 8 / the tile size (exercises padding).
    n2 = 37
    x2 = jax.random.normal(jax.random.PRNGKey(1), (n2, input_dim), jnp.float32)
    q2 = jax.block_until_ready(qnetwork_forward(x2, prep_f32))
    assert q2.shape == (n2, output_dim)
    assert jnp.allclose(q2, reference_forward(x2, params), atol=1e-4, rtol=1e-4)

    print("KERNEL_OK")
</pallas_src>

<mosaic_0001>
module attributes {stable_mosaic.version = 11 : i64} {
  func.func @qnetwork_kernel(%arg0: i32, %arg1: memref<8x16xf32, #tpu.memory_space<vmem>>, %arg2: memref<16x32xf32, #tpu.memory_space<vmem>>, %arg3: memref<32x32xf32, #tpu.memory_space<vmem>>, %arg4: memref<32x32xf32, #tpu.memory_space<vmem>>, %arg5: memref<32x4xf32, #tpu.memory_space<vmem>>, %arg6: memref<4x32xf32, #tpu.memory_space<vmem>>, %arg7: memref<3xf32, #tpu.memory_space<smem>>, %arg8: memref<8x4xf32, #tpu.memory_space<vmem>>) attributes {dimension_semantics = [#tpu.dimension_semantics<parallel>], iteration_bounds = array<i64: 1>, scalar_prefetch = 0 : i64, scratch_operands = 0 : i64, tpu.core_type = #tpu.core_type<tc>, window_params = [{transform_indices = @transform_0, window_bounds = array<i64: 8, 16>}, {pipeline_mode = #tpu.pipeline_mode<synchronous>, transform_indices = @transform_1, window_bounds = array<i64: 16, 32>}, {pipeline_mode = #tpu.pipeline_mode<synchronous>, transform_indices = @transform_2, window_bounds = array<i64: 32, 32>}, {pipeline_mode = #tpu.pipeline_mode<synchronous>, transform_indices = @transform_3, window_bounds = array<i64: 32, 32>}, {pipeline_mode = #tpu.pipeline_mode<synchronous>, transform_indices = @transform_4, window_bounds = array<i64: 32, 4>}, {pipeline_mode = #tpu.pipeline_mode<synchronous>, transform_indices = @transform_5, window_bounds = array<i64: 4, 32>}, {transform_indices = @transform_6, window_bounds = array<i64: 3>}, {transform_indices = @transform_7, window_bounds = array<i64: 8, 4>}]} {
    %c0 = arith.constant 0 : index
    %c0_0 = arith.constant 0 : index
    %0 = vector.load %arg6[%c0, %c0_0] : memref<4x32xf32, #tpu.memory_space<vmem>>, vector<4x32xf32>
    %1 = vector.extract_strided_slice %0 {offsets = [0, 0], sizes = [1, 32], strides = [1, 1]} : vector<4x32xf32> to vector<1x32xf32>
    %2 = vector.extract_strided_slice %0 {offsets = [1, 0], sizes = [1, 32], strides = [1, 1]} : vector<4x32xf32> to vector<1x32xf32>
    %3 = vector.extract_strided_slice %0 {offsets = [2, 0], sizes = [1, 32], strides = [1, 1]} : vector<4x32xf32> to vector<1x32xf32>
    %4 = vector.extract_strided_slice %0 {offsets = [3, 0], sizes = [1, 4], strides = [1, 1]} : vector<4x32xf32> to vector<1x4xf32>
    %c0_1 = arith.constant 0 : index
    %5 = memref.load %arg7[%c0_1] : memref<3xf32, #tpu.memory_space<smem>>
    %c1 = arith.constant 1 : index
    %6 = memref.load %arg7[%c1] : memref<3xf32, #tpu.memory_space<smem>>
    %c2 = arith.constant 2 : index
    %7 = memref.load %arg7[%c2] : memref<3xf32, #tpu.memory_space<smem>>
    %c0_2 = arith.constant 0 : index
    %c0_3 = arith.constant 0 : index
    %8 = vector.load %arg1[%c0_2, %c0_3] : memref<8x16xf32, #tpu.memory_space<vmem>>, vector<8x16xf32>
    %c0_4 = arith.constant 0 : index
    %c0_5 = arith.constant 0 : index
    %9 = vector.load %arg2[%c0_4, %c0_5] : memref<16x32xf32, #tpu.memory_space<vmem>>, vector<16x32xf32>
    %cst = arith.constant dense<0.000000e+00> : vector<8x32xf32>
    %10 = tpu.matmul %8, %9, %cst {dimension_numbers = #tpu.dot_dimension_numbers<[1], [0], [0], [1], [0, 0, 1, 1], [], []>} : vector<8x16xf32>, vector<16x32xf32>, vector<8x32xf32> -> vector<8x32xf32>
    %11 = vector.broadcast %1 : vector<1x32xf32> to vector<8x32xf32>
    %12 = arith.addf %10, %11 : vector<8x32xf32>
    %cst_6 = arith.constant 0.000000e+00 : f32
    %13 = vector.broadcast %cst_6 : f32 to vector<8x32xf32>
    %14 = arith.cmpf ogt, %12, %13 : vector<8x32xf32>
    %15 = vector.broadcast %5 : f32 to vector<8x32xf32>
    %16 = arith.mulf %15, %12 : vector<8x32xf32>
    %17 = arith.select %14, %12, %16 : vector<8x32xi1>, vector<8x32xf32>
    %c0_7 = arith.constant 0 : index
    %c0_8 = arith.constant 0 : index
    %18 = vector.load %arg3[%c0_7, %c0_8] : memref<32x32xf32, #tpu.memory_space<vmem>>, vector<32x32xf32>
    %cst_9 = arith.constant dense<0.000000e+00> : vector<8x32xf32>
    %19 = tpu.matmul %17, %18, %cst_9 {dimension_numbers = #tpu.dot_dimension_numbers<[1], [0], [0], [1], [0, 0, 1, 1], [], []>} : vector<8x32xf32>, vector<32x32xf32>, vector<8x32xf32> -> vector<8x32xf32>
    %20 = vector.broadcast %2 : vector<1x32xf32> to vector<8x32xf32>
    %21 = arith.addf %19, %20 : vector<8x32xf32>
    %cst_10 = arith.constant 0.000000e+00 : f32
    %22 = vector.broadcast %cst_10 : f32 to vector<8x32xf32>
    %23 = arith.cmpf ogt, %21, %22 : vector<8x32xf32>
    %24 = vector.broadcast %6 : f32 to vector<8x32xf32>
    %25 = arith.mulf %24, %21 : vector<8x32xf32>
    %26 = arith.select %23, %21, %25 : vector<8x32xi1>, vector<8x32xf32>
    %c0_11 = arith.constant 0 : index
    %c0_12 = arith.constant 0 : index
    %27 = vector.load %arg4[%c0_11, %c0_12] : memref<32x32xf32, #tpu.memory_space<vmem>>, vector<32x32xf32>
    %cst_13 = arith.constant dense<0.000000e+00> : vector<8x32xf32>
    %28 = tpu.matmul %26, %27, %cst_13 {dimension_numbers = #tpu.dot_dimension_numbers<[1], [0], [0], [1], [0, 0, 1, 1], [], []>} : vector<8x32xf32>, vector<32x32xf32>, vector<8x32xf32> -> vector<8x32xf32>
    %29 = vector.broadcast %3 : vector<1x32xf32> to vector<8x32xf32>
    %30 = arith.addf %28, %29 : vector<8x32xf32>
    %cst_14 = arith.constant 0.000000e+00 : f32
    %31 = vector.broadcast %cst_14 : f32 to vector<8x32xf32>
    %32 = arith.cmpf ogt, %30, %31 : vector<8x32xf32>
    %33 = vector.broadcast %7 : f32 to vector<8x32xf32>
    %34 = arith.mulf %33, %30 : vector<8x32xf32>
    %35 = arith.select %32, %30, %34 : vector<8x32xi1>, vector<8x32xf32>
    %c0_15 = arith.constant 0 : index
    %c0_16 = arith.constant 0 : index
    %36 = vector.load %arg5[%c0_15, %c0_16] : memref<32x4xf32, #tpu.memory_space<vmem>>, vector<32x4xf32>
    %cst_17 = arith.constant dense<0.000000e+00> : vector<8x4xf32>
    %37 = tpu.matmul %35, %36, %cst_17 {dimension_numbers = #tpu.dot_dimension_numbers<[1], [0], [0], [1], [0, 0, 1, 1], [], []>} : vector<8x32xf32>, vector<32x4xf32>, vector<8x4xf32> -> vector<8x4xf32>
    %38 = vector.broadcast %4 : vector<1x4xf32> to vector<8x4xf32>
    %39 = arith.addf %37, %38 : vector<8x4xf32>
    %c0_18 = arith.constant 0 : index
    %c0_19 = arith.constant 0 : index
    %40 = vector.load %arg8[%c0_18, %c0_19] : memref<8x4xf32, #tpu.memory_space<vmem>>, vector<8x4xf32>
    tpu.vector_store %arg8[%c0_18, %c0_19], %39 {strides = array<i32>} : memref<8x4xf32, #tpu.memory_space<vmem>>, vector<8x4xf32>,
    return
  }
  func.func @transform_0(%arg0: i32) -> (i32, i32) {
    %c0_i32 = arith.constant 0 : i32
    %c0_i32_0 = arith.constant 0 : i32
    return %arg0, %c0_i32 : i32, i32
  }
  func.func @transform_1(%arg0: i32) -> (i32, i32) {
    %c0_i32 = arith.constant 0 : i32
    %c0_i32_0 = arith.constant 0 : i32
    %c0_i32_1 = arith.constant 0 : i32
    return %c0_i32, %c0_i32_0 : i32, i32
  }
  func.func @transform_2(%arg0: i32) -> (i32, i32) {
    %c0_i32 = arith.constant 0 : i32
    %c0_i32_0 = arith.constant 0 : i32
    %c0_i32_1 = arith.constant 0 : i32
    return %c0_i32, %c0_i32_0 : i32, i32
  }
  func.func @transform_3(%arg0: i32) -> (i32, i32) {
    %c0_i32 = arith.constant 0 : i32
    %c0_i32_0 = arith.constant 0 : i32
    %c0_i32_1 = arith.constant 0 : i32
    return %c0_i32, %c0_i32_0 : i32, i32
  }
  func.func @transform_4(%arg0: i32) -> (i32, i32) {
    %c0_i32 = arith.constant 0 : i32
    %c0_i32_0 = arith.constant 0 : i32
    %c0_i32_1 = arith.constant 0 : i32
    return %c0_i32, %c0_i32_0 : i32, i32
  }
  func.func @transform_5(%arg0: i32) -> (i32, i32) {
    %c0_i32 = arith.constant 0 : i32
    %c0_i32_0 = arith.constant 0 : i32
    %c0_i32_1 = arith.constant 0 : i32
    return %c0_i32, %c0_i32_0 : i32, i32
  }
  func.func @transform_6(%arg0: i32) -> i32 {
    %c0_i32 = arith.constant 0 : i32
    %c0_i32_0 = arith.constant 0 : i32
    return %c0_i32 : i32
  }
  func.func @transform_7(%arg0: i32) -> (i32, i32) {
    %c0_i32 = arith.constant 0 : i32
    %c0_i32_0 = arith.constant 0 : i32
    return %arg0, %c0_i32 : i32, i32
  }
}

module attributes {stable_mosaic.version = 11 : i64} {
  func.func @qnetwork_kernel(%arg0: i32, %arg1: memref<8x16xf32, #tpu.memory_space<vmem>>, %arg2: memref<16x32xf32, #tpu.memory_space<vmem>>, %arg3: memref<32x32xf32, #tpu.memory_space<vmem>>, %arg4: memref<32x32xf32, #tpu.memory_space<vmem>>, %arg5: memref<32x4xf32, #tpu.memory_space<vmem>>, %arg6: memref<4x32xf32, #tpu.memory_space<vmem>>, %arg7: memref<3xf32, #tpu.memory_space<smem>>, %arg8: memref<8x4xf32, #tpu.memory_space<vmem>>) attributes {dimension_semantics = [#tpu.dimension_semantics<parallel>], iteration_bounds = array<i64: 1>, scalar_prefetch = 0 : i64, scratch_operands = 0 : i64, tpu.core_type = #tpu.core_type<tc>, window_params = [{transform_indices = @transform_0, window_bounds = array<i64: 8, 16>}, {pipeline_mode = #tpu.pipeline_mode<synchronous>, transform_indices = @transform_1, window_bounds = array<i64: 16, 32>}, {pipeline_mode = #tpu.pipeline_mode<synchronous>, transform_indices = @transform_2, window_bounds = array<i64: 32, 32>}, {pipeline_mode = #tpu.pipeline_mode<synchronous>, transform_indices = @transform_3, window_bounds = array<i64: 32, 32>}, {pipeline_mode = #tpu.pipeline_mode<synchronous>, transform_indices = @transform_4, window_bounds = array<i64: 32, 4>}, {pipeline_mode = #tpu.pipeline_mode<synchronous>, transform_indices = @transform_5, window_bounds = array<i64: 4, 32>}, {transform_indices = @transform_6, window_bounds = array<i64: 3>}, {transform_indices = @transform_7, window_bounds = array<i64: 8, 4>}]} {
    %c0 = arith.constant 0 : index
    %c0_0 = arith.constant 0 : index
    %0 = vector.load %arg6[%c0, %c0_0] : memref<4x32xf32, #tpu.memory_space<vmem>>, vector<4x32xf32>
    %1 = vector.extract_strided_slice %0 {offsets = [0, 0], sizes = [1, 32], strides = [1, 1]} : vector<4x32xf32> to vector<1x32xf32>
    %2 = vector.extract_strided_slice %0 {offsets = [1, 0], sizes = [1, 32], strides = [1, 1]} : vector<4x32xf32> to vector<1x32xf32>
    %3 = vector.extract_strided_slice %0 {offsets = [2, 0], sizes = [1, 32], strides = [1, 1]} : vector<4x32xf32> to vector<1x32xf32>
    %4 = vector.extract_strided_slice %0 {offsets = [3, 0], sizes = [1, 4], strides = [1, 1]} : vector<4x32xf32> to vector<1x4xf32>
    %c0_1 = arith.constant 0 : index
    %5 = memref.load %arg7[%c0_1] : memref<3xf32, #tpu.memory_space<smem>>
    %c1 = arith.constant 1 : index
    %6 = memref.load %arg7[%c1] : memref<3xf32, #tpu.memory_space<smem>>
    %c2 = arith.constant 2 : index
    %7 = memref.load %arg7[%c2] : memref<3xf32, #tpu.memory_space<smem>>
    %c0_2 = arith.constant 0 : index
    %c0_3 = arith.constant 0 : index
    %8 = vector.load %arg1[%c0_2, %c0_3] : memref<8x16xf32, #tpu.memory_space<vmem>>, vector<8x16xf32>
    %c0_4 = arith.constant 0 : index
    %c0_5 = arith.constant 0 : index
    %9 = vector.load %arg2[%c0_4, %c0_5] : memref<16x32xf32, #tpu.memory_space<vmem>>, vector<16x32xf32>
    %cst = arith.constant dense<0.000000e+00> : vector<8x32xf32>
    %10 = tpu.matmul %8, %9, %cst {dimension_numbers = #tpu.dot_dimension_numbers<[1], [0], [0], [1], [0, 0, 1, 1], [], []>} : vector<8x16xf32>, vector<16x32xf32>, vector<8x32xf32> -> vector<8x32xf32>
    %11 = vector.broadcast %1 : vector<1x32xf32> to vector<8x32xf32>
    %12 = arith.addf %10, %11 : vector<8x32xf32>
    %cst_6 = arith.constant 0.000000e+00 : f32
    %13 = vector.broadcast %cst_6 : f32 to vector<8x32xf32>
    %14 = arith.cmpf ogt, %12, %13 : vector<8x32xf32>
    %15 = vector.broadcast %5 : f32 to vector<8x32xf32>
    %16 = arith.mulf %15, %12 : vector<8x32xf32>
    %17 = arith.select %14, %12, %16 : vector<8x32xi1>, vector<8x32xf32>
    %c0_7 = arith.constant 0 : index
    %c0_8 = arith.constant 0 : index
    %18 = vector.load %arg3[%c0_7, %c0_8] : memref<32x32xf32, #tpu.memory_space<vmem>>, vector<32x32xf32>
    %cst_9 = arith.constant dense<0.000000e+00> : vector<8x32xf32>
    %19 = tpu.matmul %17, %18, %cst_9 {dimension_numbers = #tpu.dot_dimension_numbers<[1], [0], [0], [1], [0, 0, 1, 1], [], []>} : vector<8x32xf32>, vector<32x32xf32>, vector<8x32xf32> -> vector<8x32xf32>
    %20 = vector.broadcast %2 : vector<1x32xf32> to vector<8x32xf32>
    %21 = arith.addf %19, %20 : vector<8x32xf32>
    %cst_10 = arith.constant 0.000000e+00 : f32
    %22 = vector.broadcast %cst_10 : f32 to vector<8x32xf32>
    %23 = arith.cmpf ogt, %21, %22 : vector<8x32xf32>
    %24 = vector.broadcast %6 : f32 to vector<8x32xf32>
    %25 = arith.mulf %24, %21 : vector<8x32xf32>
    %26 = arith.select %23, %21, %25 : vector<8x32xi1>, vector<8x32xf32>
    %c0_11 = arith.constant 0 : index
    %c0_12 = arith.constant 0 : index
    %27 = vector.load %arg4[%c0_11, %c0_12] : memref<32x32xf32, #tpu.memory_space<vmem>>, vector<32x32xf32>
    %cst_13 = arith.constant dense<0.000000e+00> : vector<8x32xf32>
    %28 = tpu.matmul %26, %27, %cst_13 {dimension_numbers = #tpu.dot_dimension_numbers<[1], [0], [0], [1], [0, 0, 1, 1], [], []>} : vector<8x32xf32>, vector<32x32xf32>, vector<8x32xf32> -> vector<8x32xf32>
    %29 = vector.broadcast %3 : vector<1x32xf32> to vector<8x32xf32>
    %30 = arith.addf %28, %29 : vector<8x32xf32>
    %cst_14 = arith.constant 0.000000e+00 : f32
    %31 = vector.broadcast %cst_14 : f32 to vector<8x32xf32>
    %32 = arith.cmpf ogt, %30, %31 : vector<8x32xf32>
    %33 = vector.broadcast %7 : f32 to vector<8x32xf32>
    %34 = arith.mulf %33, %30 : vector<8x32xf32>
    %35 = arith.select %32, %30, %34 : vector<8x32xi1>, vector<8x32xf32>
    %c0_15 = arith.constant 0 : index
    %c0_16 = arith.constant 0 : index
    %36 = vector.load %arg5[%c0_15, %c0_16] : memref<32x4xf32, #tpu.memory_space<vmem>>, vector<32x4xf32>
    %cst_17 = arith.constant dense<0.000000e+00> : vector<8x4xf32>
    %37 = tpu.matmul %35, %36, %cst_17 {dimension_numbers = #tpu.dot_dimension_numbers<[1], [0], [0], [1], [0, 0, 1, 1], [], []>} : vector<8x32xf32>, vector<32x4xf32>, vector<8x4xf32> -> vector<8x4xf32>
    %38 = vector.broadcast %4 : vector<1x4xf32> to vector<8x4xf32>
    %39 = arith.addf %37, %38 : vector<8x4xf32>
    %c0_18 = arith.constant 0 : index
    %c0_19 = arith.constant 0 : index
    %40 = vector.load %arg8[%c0_18, %c0_19] : memref<8x4xf32, #tpu.memory_space<vmem>>, vector<8x4xf32>
    tpu.vector_store %arg8[%c0_18, %c0_19], %39 {strides = array<i32>} : memref<8x4xf32, #tpu.memory_space<vmem>>, vector<8x4xf32>,
    return
  }
  func.func @transform_0(%arg0: i32) -> (i32, i32) {
    %c0_i32 = arith.constant 0 : i32
    %c0_i32_0 = arith.constant 0 : i32
    return %arg0, %c0_i32 : i32, i32
  }
  func.func @transform_1(%arg0: i32) -> (i32, i32) {
    %c0_i32 = arith.constant 0 : i32
    %c0_i32_0 = arith.constant 0 : i32
    %c0_i32_1 = arith.constant 0 : i32
    return %c0_i32, %c0_i32_0 : i32, i32
  }
  func.func @transform_2(%arg0: i32) -> (i32, i32) {
    %c0_i32 = arith.constant 0 : i32
    %c0_i32_0 = arith.constant 0 : i32
    %c0_i32_1 = arith.constant 0 : i32
    return %c0_i32, %c0_i32_0 : i32, i32
  }
  func.func @transform_3(%arg0: i32) -> (i32, i32) {
    %c0_i32 = arith.constant 0 : i32
    %c0_i32_0 = arith.constant 0 : i32
    %c0_i32_1 = arith.constant 0 : i32
    return %c0_i32, %c0_i32_0 : i32, i32
  }
  func.func @transform_4(%arg0: i32) -> (i32, i32) {
    %c0_i32 = arith.constant 0 : i32
    %c0_i32_0 = arith.constant 0 : i32
    %c0_i32_1 = arith.constant 0 : i32
    return %c0_i32, %c0_i32_0 : i32, i32
  }
  func.func @transform_5(%arg0: i32) -> (i32, i32) {
    %c0_i32 = arith.constant 0 : i32
    %c0_i32_0 = arith.constant 0 : i32
    %c0_i32_1 = arith.constant 0 : i32
    return %c0_i32, %c0_i32_0 : i32, i32
  }
  func.func @transform_6(%arg0: i32) -> i32 {
    %c0_i32 = arith.constant 0 : i32
    %c0_i32_0 = arith.constant 0 : i32
    return %c0_i32 : i32
  }
  func.func @transform_7(%arg0: i32) -> (i32, i32) {
    %c0_i32 = arith.constant 0 : i32
    %c0_i32_0 = arith.constant 0 : i32
    return %arg0, %c0_i32 : i32, i32
  }
}

</mosaic_0001>

<bundles_post_ra>
// kernel: tpu_custom_call.1
= control target key start
LH: loop header
LB: loop body
LE: loop exit
PB: predicated region body
PF: predicated region fallthrough
CT: control target
= control target key end

     0   :  { %12 = vsyncpa [#allocation3], 0  ;;  %s687_s0 = inlined_call_operand.vmem [shape: f32[8,16], index: 0, kind: input, shape index: {}]   ;;  %s688_s1 = inlined_call_operand.hbm [shape: f32[16,32], index: 1, kind: input, shape index: {}]   ;;  %s689_s2 = inlined_call_operand.vmem [shape: f32[32,32], index: 2, kind: input, shape index: {}]   ;;  %s690_s3 = inlined_call_operand.hbm [shape: f32[32,32], index: 3, kind: input, shape index: {}]   ;;  %s691_s4 = inlined_call_operand.vmem [shape: f32[32,4], index: 4, kind: input, shape index: {}]   ;;  %s692_s5 = inlined_call_operand.vmem [shape: f32[4,32], index: 5, kind: input, shape index: {}]   ;;  %s693_s6 = inlined_call_operand.vmem [shape: f32[3], index: 6, kind: input, shape index: {}]   ;;  %s694_s7 = inlined_call_operand.vmem [shape: f32[8,4], index: 7, kind: output, shape index: {}]  }
   0x1   :  { %13 = vsyncpa [#allocation6], 0 }
   0x2   :  { %14 = vsyncpa [#allocation4], 0  ;;  %s572_s24 = smov [#allocation2]   ;;  %s510_s28 = scalar_lea.hbm %s688_s1, 256 }
   0x3   :  { %s22_s25 = sshll.u32 %s572_s24, 4  ;;  %p511_p0 = scmp.ne.s32.totalorder %s688_s1, %s510_s28  ;;  %s23_s25 = int_to_ptr.vmem [resolvable:$true] %s22_s25 }
   0x4   :  { %p514_p1 = scmp.lt.u32.totalorder %s510_s28, %s688_s1 }
   0x6   :  { %p516_p2 = pnand %p514_p1, %p511_p0 }
   0x8   :  { %519 = shalt.err (!%p516_p2)
}
   0x9   :  { %s520_s10 = scalar_lea.vmem %s23_s25, 256  ;;  %p525_p4 = scmp.lt.s32.totalorder %s23_s25, %s23_s25 }
   0xa   :  { %p521_p3 = scmp.ne.s32.totalorder %s23_s25, %s520_s10  ;;  %p526_p5 = scmp.lt.s32.totalorder %s520_s10, %s520_s10 }
   0xc   :  { %p527_p6 = por %p526_p5, %p525_p4 }
   0xe   :  { %p528_p7 = pnand %p527_p6, %p521_p3 }
  0x10   :  { %531 = shalt.err (!%p528_p7)
}
  0x11   :  { %s573_s11 = smov 128   ;;  %s574_s12 = smov 8  }
  0x12   :  { %28 = dma.hbm_to_vmem [thread:$0]  %s688_s1, 256, %s23_s25, [#allocation3], %s573_s11, %s573_s11, %s574_s12  }
  0x13   :  { %s575_s15 = smov [#allocation5]   ;;  %s53_s19 = sshll.u32 %s693_s6, 4  ;;  %s54_s19 = int_to_ptr.vmem [resolvable:$true] %s53_s19 }
  0x14   :  { %s36_s16 = sshll.u32 %s575_s15, 4  ;;  %s532_s22 = scalar_lea.hbm %s690_s3, 512  ;;  %s37_s16 = int_to_ptr.vmem [resolvable:$true] %s36_s16 }
  0x15   :  { %p533_p8 = scmp.ne.s32.totalorder %s690_s3, %s532_s22  ;;  %p536_p9 = scmp.lt.u32.totalorder %s532_s22, %s690_s3 }
  0x17   :  { %p538_p10 = pnand %p536_p9, %p533_p8 }
  0x19   :  { %541 = shalt.err (!%p538_p10)
}
  0x1a   :  { %s542_s1 = scalar_lea.vmem %s37_s16, 512  ;;  %p547_p12 = scmp.lt.s32.totalorder %s37_s16, %s37_s16 }
  0x1b   :  { %p543_p11 = scmp.ne.s32.totalorder %s37_s16, %s542_s1  ;;  %p548_p13 = scmp.lt.s32.totalorder %s542_s1, %s542_s1 }
  0x1d   :  { %p549_p0 = por %p548_p13, %p547_p12 }
  0x1f   :  { %p550_p1 = pnand %p549_p0, %p543_p11 }
  0x21   :  { %553 = shalt.err (!%p550_p1)
}
  0x22   :  { %42 = dma.hbm_to_vmem [thread:$0]  %s690_s3, 512, %s37_s16, [#allocation6], %s573_s11, %s573_s11, %s574_s12  }
  0x23   :  { %s554_s28 = scalar_lea.vmem %s54_s19, 16  ;;  %p559_p3 = scmp.lt.s32.totalorder %s54_s19, %s54_s19 }
  0x24   :  { %p555_p2 = scmp.ne.s32.totalorder %s54_s19, %s554_s28  ;;  %p560_p4 = scmp.lt.s32.totalorder %s554_s28, %s554_s28 }
  0x26   :  { %p561_p5 = por %p560_p4, %p559_p3 }
  0x28   :  { %p562_p6 = pnand %p561_p5, %p555_p2 }
  0x2a   :  { %565 = shalt.err (!%p562_p6)
}
  0x2b   :  { %s576_s29 = smov [#allocation7]  }
  0x2c   :  { %56 = dma.vmem_to_smem %s54_s19, 16, %s576_s29, [#allocation4]  }
  0x2d   :  { %566 = dma.done.wait [#allocation3], 256  }
  0x2e   :  { %567 = vsyncadd [#allocation3], 4294967040 }
  0x2f   :  { %568 = dma.done.wait [#allocation6], 512  }
  0x30   :  { %569 = vsyncadd [#allocation6], 4294966784 }
  0x31   :  { %570 = dma.done.wait [#allocation4], 16  }
  0x32   :  { %571 = vsyncadd [#allocation4], 4294967280 }
  0x33   :  { %66 = sfence }
  0x34   :  { %v72_v0 = vld [vmem:[#allocation2] sm:$0xff]  ;;  %v73_v1 = vld [vmem:[#allocation2 + $0x8] sm:$0xff]  ;;  %v577_v2 = vmov 0.0|0.0   ;;  %vm578_vm0 = vmmov 0   ;;  %v579_v4 = vmov 0.0   ;;  %vm78_vm1 = vcmask 130048  }
  0x35   :  { %481 = vmatprep.subr.bf16.mxu0 %v577_v2  ;;  %v482_v3 = vpack.c.bf16 %v73_v1, %v72_v0  ;;  %445 = vmatprep.mubr.msk.f32.mxu0 %vm578_vm0, %v579_v4  ;;  %v156_v5 = vld [vmem:[%s689_s2] sm:$0xff]  ;;  %v157_v6 = vld [vmem:[%s689_s2 + $0x8] sm:$0xff]  ;;  %v158_v9 = vld [vmem:[%s689_s2 + $0x10] sm:$0xff]  ;;  %v74_v15 = vlaneseq  ;;  %vm164_vm3 = vcmask 261120   ;;  %s417_s20 = sld [smem:[#allocation7 + $0x1]]  ;;  %s418_s26 = sld [smem:[#allocation7 + $0x2]] }
  0x36   :  { %484 = vmatprep.subr.bf16.mxu1 %v577_v2  ;;  %v485_v7 = vpack.c.bf16 %v157_v6, %v156_v5  ;;  %456 = vmatprep.mubr.msk.f32.mxu1 %vm578_vm0, %v579_v4  ;;  %v71_v8 = vld [vmem:[%s687_s0] sm:$0xff]  ;;  %v159_v10 = vld [vmem:[%s689_s2 + $0x18] sm:$0xff]  ;;  %v242_v12 = vld [vmem:[#allocation5] sm:$0xff]  ;;  %s68_s0 = sld [smem:[#allocation7]]  ;;  %vm408_vm6 = vcmask 31744  }
  0x37   :  { %483 = vmatpush3.bf16.msra.mxu0 %v482_v3  ;;  %v488_v11 = vpack.c.bf16 %v159_v10, %v158_v9  ;;  %v243_v13 = vld [vmem:[#allocation5 + $0x8] sm:$0xff]  ;;  %v75_v16 = vshrl.u32 %v74_v15, 7  ;;  %v67_v18 = vld [vmem:[%s692_s5] sm:$0xf]  ;;  %v245_v27 = vld [vmem:[#allocation5 + $0x18] sm:$0xff] }
  0x38   :  { %486 = vmatpush3.bf16.msra.mxu1 %v485_v7  ;;  %490 = vmatprep.subr.bf16.mxu0 %v577_v2  ;;  %v491_v14 = vpack.c.bf16 %v243_v13, %v242_v12  ;;  %v244_v26 = vld [vmem:[#allocation5 + $0x10] sm:$0xff]  ;;  %v328_v30 = vld [vmem:[%s691_s4 + $0x8] sm:$0xff]  ;;  %v329_v40 = vld [vmem:[%s691_s4 + $0x10] sm:$0xff] }
  0x39   :  { %487 = vmatprep.subr.bf16.mxu1 %v577_v2  ;;  %v76_v17 = vsub.s32 0, %v75_v16  ;;  %v494_v28 = vpack.c.bf16 %v245_v27, %v244_v26  ;;  %v327_v29 = vld [vmem:[%s691_s4] sm:$0xff]  ;;  %v162_v32 = vsub.s32 1, %v75_v16  ;;  %v330_v41 = vld [vmem:[%s691_s4 + $0x18] sm:$0xff]  ;;  %v248_v43 = vsub.s32 2, %v75_v16 }
  0x3a   :  { %446 = vmatmul.mubr.msk.f32.vlgmr.msra.gmra.mrb[0].mxu0 %vm78_vm1, %v71_v8  ;;  %v497_v31 = vpack.c.bf16 %v328_v30, %v327_v29  ;;  %v500_v42 = vpack.c.bf16 %v330_v41, %v329_v40  ;;  %v333_v51 = vsub.s32 3, %v75_v16 }
  0x3b   :  { %467 = vmatprep.mubr.msk.f32.mxu0 %vm578_vm0, %v579_v4  ;;  %492 = vmatpush3.bf16.msra.mxu0 %v491_v14  ;;  %v77_v19 = vrot.slane %v67_v18, %v76_v17  ;;  %v163_v33 = vrot.slane %v67_v18, %v162_v32  ;;  %v239_v35 = vstv %s417_s20  ;;  %v249_v44 = vrot.slane %v67_v18, %v248_v43 }
  0x3c   :  { %489 = vmatpush3.bf16.msra.mxu1 %v488_v11  ;;  %493 = vmatprep.subr.bf16.mxu0 %v577_v2  ;;  %v153_v21 = vstv %s68_s0  ;;  %v324_v46 = vstv %s418_s26  ;;  %v334_v52 = vrot.slane %v67_v18, %v333_v51 }
  0x3d   :  { %496 = vmatprep.subr.bf16.mxu1 %v577_v2 }
  0x3f   :  { %495 = vmatpush3.bf16.msra.mxu0 %v494_v28 }
 0x10d   :  { %v148_v20 = vpop.f32.mrb[0].mxu0 }
 0x10e   :  { %v149_v22 = vadd.f32 %v148_v20, %v77_v19  ;;  %v447_v23 = vpop.f32.mrb[1].mxu0 }
 0x110   :  { %vm152_vm2 = vcmp.gt.f32.partialorder %v149_v22, 0.0  ;;  %v154_v24 = vmul.f32 %v153_v21, %v149_v22 }
 0x112   :  { %v155_v25 = vsel %vm152_vm2, %v149_v22, %v154_v24 }
 0x113   :  { %457 = vmatmul.mubr.msk.f32.vlgmr.msra.gmra.mrb[0].mxu1 %vm164_vm3, %v155_v25 }
 0x114   :  { %478 = vmatprep.mubr.msk.f32.mxu1 %vm578_vm0, %v579_v4  ;;  %498 = vmatpush3.bf16.msra.mxu1 %v497_v31 }
 0x115   :  { %499 = vmatprep.subr.bf16.mxu1 %v577_v2 }
 0x118   :  { %501 = vmatpush3.bf16.msra.mxu1 %v500_v42 }
 0x1e6   :  { %v234_v34 = vpop.f32.mrb[0].mxu1 }
 0x1e7   :  { %v235_v36 = vadd.f32 %v234_v34, %v163_v33  ;;  %v458_v37 = vpop.f32.mrb[1].mxu1 }
 0x1e9   :  { %vm238_vm4 = vcmp.gt.f32.partialorder %v235_v36, 0.0  ;;  %v240_v38 = vmul.f32 %v239_v35, %v235_v36 }
 0x1eb   :  { %v241_v39 = vsel %vm238_vm4, %v235_v36, %v240_v38 }
 0x1ec   :  { %468 = vmatmul.mubr.msk.f32.vlgmr.msra.gmra.mrb[2].mxu0 %vm164_vm3, %v241_v39 }
 0x2bf   :  { %v319_v45 = vpop.f32.mrb[2].mxu0 }
 0x2c0   :  { %v320_v47 = vadd.f32 %v319_v45, %v249_v44  ;;  %v469_v48 = vpop.f32.mrb[3].mxu0 }
 0x2c2   :  { %vm323_vm5 = vcmp.gt.f32.partialorder %v320_v47, 0.0  ;;  %v325_v49 = vmul.f32 %v324_v46, %v320_v47 }
 0x2c4   :  { %v326_v50 = vsel %vm323_vm5, %v320_v47, %v325_v49 }
 0x2c5   :  { %479 = vmatmul.mubr.msk.f32.vlgmr.msra.gmra.mrb[2].mxu1 %vm164_vm3, %v326_v50 }
 0x398   :  { %v404_v53 = vpop.f32.mrb[2].mxu1 }
 0x399   :  { %v405_v54 = vadd.f32 %v404_v53, %v334_v52  ;;  %v480_v55 = vpop.f32.mrb[3].mxu1 }
 0x39b   :  { %409 = vst.msk [vmem:[%s694_s7] sm:$0xff] %vm408_vm6, %v405_v54 }
 0x39c   :  { %414 = vsyncpa [#allocation3], 1 }
 0x39d   :  { %415 = vsyncpa [#allocation6], 1 }
 0x39e   :  { %416 = vsyncpa [#allocation4], 1 }

// kernel: tpu_custom_call.1
= control target key start
LH: loop header
LB: loop body
LE: loop exit
PB: predicated region body
PF: predicated region fallthrough
CT: control target
= control target key end

     0   :  { %12 = vsyncpa [#allocation3], 0  ;;  %s687_s0 = inlined_call_operand.vmem [shape: f32[8,16], index: 0, kind: input, shape index: {}]   ;;  %s688_s1 = inlined_call_operand.hbm [shape: f32[16,32], index: 1, kind: input, shape index: {}]   ;;  %s689_s2 = inlined_call_operand.vmem [shape: f32[32,32], index: 2, kind: input, shape index: {}]   ;;  %s690_s3 = inlined_call_operand.hbm [shape: f32[32,32], index: 3, kind: input, shape index: {}]   ;;  %s691_s4 = inlined_call_operand.vmem [shape: f32[32,4], index: 4, kind: input, shape index: {}]   ;;  %s692_s5 = inlined_call_operand.vmem [shape: f32[4,32], index: 5, kind: input, shape index: {}]   ;;  %s693_s6 = inlined_call_operand.vmem [shape: f32[3], index: 6, kind: input, shape index: {}]   ;;  %s694_s7 = inlined_call_operand.vmem [shape: f32[8,4], index: 7, kind: output, shape index: {}]  }
   0x1   :  { %13 = vsyncpa [#allocation6], 0 }
   0x2   :  { %14 = vsyncpa [#allocation4], 0  ;;  %s572_s24 = smov [#allocation2]   ;;  %s510_s28 = scalar_lea.hbm %s688_s1, 256 }
   0x3   :  { %s22_s25 = sshll.u32 %s572_s24, 4  ;;  %p511_p0 = scmp.ne.s32.totalorder %s688_s1, %s510_s28  ;;  %s23_s25 = int_to_ptr.vmem [resolvable:$true] %s22_s25 }
   0x4   :  { %p514_p1 = scmp.lt.u32.totalorder %s510_s28, %s688_s1 }
   0x6   :  { %p516_p2 = pnand %p514_p1, %p511_p0 }
   0x8   :  { %519 = shalt.err (!%p516_p2)
}
   0x9   :  { %s520_s10 = scalar_lea.vmem %s23_s25, 256  ;;  %p525_p4 = scmp.lt.s32.totalorder %s23_s25, %s23_s25 }
   0xa   :  { %p521_p3 = scmp.ne.s32.totalorder %s23_s25, %s520_s10  ;;  %p526_p5 = scmp.lt.s32.totalorder %s520_s10, %s520_s10 }
   0xc   :  { %p527_p6 = por %p526_p5, %p525_p4 }
   0xe   :  { %p528_p7 = pnand %p527_p6, %p521_p3 }
  0x10   :  { %531 = shalt.err (!%p528_p7)
}
  0x11   :  { %s573_s11 = smov 128   ;;  %s574_s12 = smov 8  }
  0x12   :  { %28 = dma.hbm_to_vmem [thread:$0]  %s688_s1, 256, %s23_s25, [#allocation3], %s573_s11, %s573_s11, %s574_s12  }
  0x13   :  { %s575_s15 = smov [#allocation5]   ;;  %s53_s19 = sshll.u32 %s693_s6, 4  ;;  %s54_s19 = int_to_ptr.vmem [resolvable:$true] %s53_s19 }
  0x14   :  { %s36_s16 = sshll.u32 %s575_s15, 4  ;;  %s532_s22 = scalar_lea.hbm %s690_s3, 512  ;;  %s37_s16 = int_to_ptr.vmem [resolvable:$true] %s36_s16 }
  0x15   :  { %p533_p8 = scmp.ne.s32.totalorder %s690_s3, %s532_s22  ;;  %p536_p9 = scmp.lt.u32.totalorder %s532_s22, %s690_s3 }
  0x17   :  { %p538_p10 = pnand %p536_p9, %p533_p8 }
  0x19   :  { %541 = shalt.err (!%p538_p10)
}
  0x1a   :  { %s542_s1 = scalar_lea.vmem %s37_s16, 512  ;;  %p547_p12 = scmp.lt.s32.totalorder %s37_s16, %s37_s16 }
  0x1b   :  { %p543_p11 = scmp.ne.s32.totalorder %s37_s16, %s542_s1  ;;  %p548_p13 = scmp.lt.s32.totalorder %s542_s1, %s542_s1 }
  0x1d   :  { %p549_p0 = por %p548_p13, %p547_p12 }
  0x1f   :  { %p550_p1 = pnand %p549_p0, %p543_p11 }
  0x21   :  { %553 = shalt.err (!%p550_p1)
}
  0x22   :  { %42 = dma.hbm_to_vmem [thread:$0]  %s690_s3, 512, %s37_s16, [#allocation6], %s573_s11, %s573_s11, %s574_s12  }
  0x23   :  { %s554_s28 = scalar_lea.vmem %s54_s19, 16  ;;  %p559_p3 = scmp.lt.s32.totalorder %s54_s19, %s54_s19 }
  0x24   :  { %p555_p2 = scmp.ne.s32.totalorder %s54_s19, %s554_s28  ;;  %p560_p4 = scmp.lt.s32.totalorder %s554_s28, %s554_s28 }
  0x26   :  { %p561_p5 = por %p560_p4, %p559_p3 }
  0x28   :  { %p562_p6 = pnand %p561_p5, %p555_p2 }
  0x2a   :  { %565 = shalt.err (!%p562_p6)
}
  0x2b   :  { %s576_s29 = smov [#allocation7]  }
  0x2c   :  { %56 = dma.vmem_to_smem %s54_s19, 16, %s576_s29, [#allocation4]  }
  0x2d   :  { %566 = dma.done.wait [#allocation3], 256  }
  0x2e   :  { %567 = vsyncadd [#allocation3], 4294967040 }
  0x2f   :  { %568 = dma.done.wait [#allocation6], 512  }
  0x30   :  { %569 = vsyncadd [#allocation6], 4294966784 }
  0x31   :  { %570 = dma.done.wait [#allocation4], 16  }
  0x32   :  { %571 = vsyncadd [#allocation4], 4294967280 }
  0x33   :  { %66 = sfence }
  0x34   :  { %v72_v0 = vld [vmem:[#allocation2] sm:$0xff]  ;;  %v73_v1 = vld [vmem:[#allocation2 + $0x8] sm:$0xff]  ;;  %v577_v2 = vmov 0.0|0.0   ;;  %vm578_vm0 = vmmov 0   ;;  %v579_v4 = vmov 0.0   ;;  %vm78_vm1 = vcmask 130048  }
  0x35   :  { %481 = vmatprep.subr.bf16.mxu0 %v577_v2  ;;  %v482_v3 = vpack.c.bf16 %v73_v1, %v72_v0  ;;  %445 = vmatprep.mubr.msk.f32.mxu0 %vm578_vm0, %v579_v4  ;;  %v156_v5 = vld [vmem:[%s689_s2] sm:$0xff]  ;;  %v157_v6 = vld [vmem:[%s689_s2 + $0x8] sm:$0xff]  ;;  %v158_v9 = vld [vmem:[%s689_s2 + $0x10] sm:$0xff]  ;;  %v74_v15 = vlaneseq  ;;  %vm164_vm3 = vcmask 261120   ;;  %s417_s20 = sld [smem:[#allocation7 + $0x1]]  ;;  %s418_s26 = sld [smem:[#allocation7 + $0x2]] }
  0x36   :  { %484 = vmatprep.subr.bf16.mxu1 %v577_v2  ;;  %v485_v7 = vpack.c.bf16 %v157_v6, %v156_v5  ;;  %456 = vmatprep.mubr.msk.f32.mxu1 %vm578_vm0, %v579_v4  ;;  %v71_v8 = vld [vmem:[%s687_s0] sm:$0xff]  ;;  %v159_v10 = vld [vmem:[%s689_s2 + $0x18] sm:$0xff]  ;;  %v242_v12 = vld [vmem:[#allocation5] sm:$0xff]  ;;  %s68_s0 = sld [smem:[#allocation7]]  ;;  %vm408_vm6 = vcmask 31744  }
  0x37   :  { %483 = vmatpush3.bf16.msra.mxu0 %v482_v3  ;;  %v488_v11 = vpack.c.bf16 %v159_v10, %v158_v9  ;;  %v243_v13 = vld [vmem:[#allocation5 + $0x8] sm:$0xff]  ;;  %v75_v16 = vshrl.u32 %v74_v15, 7  ;;  %v67_v18 = vld [vmem:[%s692_s5] sm:$0xf]  ;;  %v245_v27 = vld [vmem:[#allocation5 + $0x18] sm:$0xff] }
  0x38   :  { %486 = vmatpush3.bf16.msra.mxu1 %v485_v7  ;;  %490 = vmatprep.subr.bf16.mxu0 %v577_v2  ;;  %v491_v14 = vpack.c.bf16 %v243_v13, %v242_v12  ;;  %v244_v26 = vld [vmem:[#allocation5 + $0x10] sm:$0xff]  ;;  %v328_v30 = vld [vmem:[%s691_s4 + $0x8] sm:$0xff]  ;;  %v329_v40 = vld [vmem:[%s691_s4 + $0x10] sm:$0xff] }
  0x39   :  { %487 = vmatprep.subr.bf16.mxu1 %v577_v2  ;;  %v76_v17 = vsub.s32 0, %v75_v16  ;;  %v494_v28 = vpack.c.bf16 %v245_v27, %v244_v26  ;;  %v327_v29 = vld [vmem:[%s691_s4] sm:$0xff]  ;;  %v162_v32 = vsub.s32 1, %v75_v16  ;;  %v330_v41 = vld [vmem:[%s691_s4 + $0x18] sm:$0xff]  ;;  %v248_v43 = vsub.s32 2, %v75_v16 }
  0x3a   :  { %446 = vmatmul.mubr.msk.f32.vlgmr.msra.gmra.mrb[0].mxu0 %vm78_vm1, %v71_v8  ;;  %v497_v31 = vpack.c.bf16 %v328_v30, %v327_v29  ;;  %v500_v42 = vpack.c.bf16 %v330_v41, %v329_v40  ;;  %v333_v51 = vsub.s32 3, %v75_v16 }
  0x3b   :  { %467 = vmatprep.mubr.msk.f32.mxu0 %vm578_vm0, %v579_v4  ;;  %492 = vmatpush3.bf16.msra.mxu0 %v491_v14  ;;  %v77_v19 = vrot.slane %v67_v18, %v76_v17  ;;  %v163_v33 = vrot.slane %v67_v18, %v162_v32  ;;  %v239_v35 = vstv %s417_s20  ;;  %v249_v44 = vrot.slane %v67_v18, %v248_v43 }
  0x3c   :  { %489 = vmatpush3.bf16.msra.mxu1 %v488_v11  ;;  %493 = vmatprep.subr.bf16.mxu0 %v577_v2  ;;  %v153_v21 = vstv %s68_s0  ;;  %v324_v46 = vstv %s418_s26  ;;  %v334_v52 = vrot.slane %v67_v18, %v333_v51 }
  0x3d   :  { %496 = vmatprep.subr.bf16.mxu1 %v577_v2 }
  0x3f   :  { %495 = vmatpush3.bf16.msra.mxu0 %v494_v28 }
 0x10d   :  { %v148_v20 = vpop.f32.mrb[0].mxu0 }
 0x10e   :  { %v149_v22 = vadd.f32 %v148_v20, %v77_v19  ;;  %v447_v23 = vpop.f32.mrb[1].mxu0 }
 0x110   :  { %vm152_vm2 = vcmp.gt.f32.partialorder %v149_v22, 0.0  ;;  %v154_v24 = vmul.f32 %v153_v21, %v149_v22 }
 0x112   :  { %v155_v25 = vsel %vm152_vm2, %v149_v22, %v154_v24 }
 0x113   :  { %457 = vmatmul.mubr.msk.f32.vlgmr.msra.gmra.mrb[0].mxu1 %vm164_vm3, %v155_v25 }
 0x114   :  { %478 = vmatprep.mubr.msk.f32.mxu1 %vm578_vm0, %v579_v4  ;;  %498 = vmatpush3.bf16.msra.mxu1 %v497_v31 }
 0x115   :  { %499 = vmatprep.subr.bf16.mxu1 %v577_v2 }
 0x118   :  { %501 = vmatpush3.bf16.msra.mxu1 %v500_v42 }
 0x1e6   :  { %v234_v34 = vpop.f32.mrb[0].mxu1 }
 0x1e7   :  { %v235_v36 = vadd.f32 %v234_v34, %v163_v33  ;;  %v458_v37 = vpop.f32.mrb[1].mxu1 }
 0x1e9   :  { %vm238_vm4 = vcmp.gt.f32.partialorder %v235_v36, 0.0  ;;  %v240_v38 = vmul.f32 %v239_v35, %v235_v36 }
 0x1eb   :  { %v241_v39 = vsel %vm238_vm4, %v235_v36, %v240_v38 }
 0x1ec   :  { %468 = vmatmul.mubr.msk.f32.vlgmr.msra.gmra.mrb[2].mxu0 %vm164_vm3, %v241_v39 }
 0x2bf   :  { %v319_v45 = vpop.f32.mrb[2].mxu0 }
 0x2c0   :  { %v320_v47 = vadd.f32 %v319_v45, %v249_v44  ;;  %v469_v48 = vpop.f32.mrb[3].mxu0 }
 0x2c2   :  { %vm323_vm5 = vcmp.gt.f32.partialorder %v320_v47, 0.0  ;;  %v325_v49 = vmul.f32 %v324_v46, %v320_v47 }
 0x2c4   :  { %v326_v50 = vsel %vm323_vm5, %v320_v47, %v325_v49 }
 0x2c5   :  { %479 = vmatmul.mubr.msk.f32.vlgmr.msra.gmra.mrb[2].mxu1 %vm164_vm3, %v326_v50 }
 0x398   :  { %v404_v53 = vpop.f32.mrb[2].mxu1 }
 0x399   :  { %v405_v54 = vadd.f32 %v404_v53, %v334_v52  ;;  %v480_v55 = vpop.f32.mrb[3].mxu1 }
 0x39b   :  { %409 = vst.msk [vmem:[%s694_s7] sm:$0xff] %vm408_vm6, %v405_v54 }
 0x39c   :  { %414 = vsyncpa [#allocation3], 1 }
 0x39d   :  { %415 = vsyncpa [#allocation6], 1 }
 0x39e   :  { %416 = vsyncpa [#allocation4], 1 }

</bundles_post_ra>
